<compile_context>
chip_gen: v6e
topology: v6e:2x2x1
jax: 0.10.0
libtpu: 0.0.40
codegen_flags: <defaults>
</compile_context>

<pallas_src>
import math

import jax
import jax.numpy as jnp
from jax.experimental import pallas as pl
from jax.experimental.pallas import tpu as pltpu


def values_kernel(xT_ref, w1T_ref, b1_ref, w2_ref, b2_ref, o_ref):
    # xT_ref : (N, TB)  input tile, batch on the 128-lane axis, norm folded
    # w1T_ref: (H, N)   layer-1 weight, transposed, norm folded
    # b1_ref : (H, 1)   layer-1 bias column, norm folded
    # w2_ref : (H, 1)   layer-2 weight column
    # b2_ref : (1, 1)   layer-2 bias, SMEM scalar
    # o_ref  : (1, TB)  lane-dense output tile
    xT = xT_ref[...]                      # (N, TB) f32
    w1T = w1T_ref[...]                    # (H, N)  f32
    n = xT.shape[0]

    if n <= 32:
        # Layer 1 on the VPU: per-feature outer-product broadcast-FMA
        # (w1 column (H,1) * x row (1,TB)), tree-summed to halve chain depth.
        terms = [w1T[:, k:k + 1] * xT[k:k + 1, :] for k in range(n)]
        while len(terms) > 1:
            nxt = [terms[i] + terms[i + 1] for i in range(0, len(terms) - 1, 2)]
            if len(terms) % 2:
                nxt.append(terms[-1])
            terms = nxt
        h = terms[0] + b1_ref[...]                               # (H, TB)
    else:
        # Fallback for larger state dims: single MXU pass.
        h = jnp.dot(w1T, xT, preferred_element_type=jnp.float32) + b1_ref[...]

    h = jnp.maximum(h, 0.0)                                      # ReLU, (H, TB)

    # Layer 2: multiply by w2 column and reduce over H (sublane direction).
    # This is mostly VPU vreg adds + one 8-sublane XLU reduce, and the result
    # lands lane-dense as (1, TB) with no relayout.
    y = jnp.sum(h * w2_ref[...], axis=0, keepdims=True) + b2_ref[0, 0]
    o_ref[...] = y.astype(o_ref.dtype)                           # (1, TB)


def values_forward(x, w1T_folded, b1_col_folded, w2_col, b2, *, max_tb=512):
    """Fused forward pass. x is (B, N); returns (B, 1) like the PyTorch module."""
    B, N = x.shape
    H = w1T_folded.shape[0]

    xT = x.T                                  # (N, B) layout plumbing, done once

    if B <= max_tb:
        tb = B                                # single block; full-extent dims are
        b_pad = B                             # exempt from the (8,128) rule
    else:
        tb = max_tb                           # multiple of 128 -> lane aligned
        b_pad = ((B + tb - 1) // tb) * tb
        if b_pad != B:
            xT = jnp.pad(xT, ((0, 0), (0, b_pad - B)))   # pad batch, slice later

    grid = (b_pad // tb,)
    # Single tile: no point asking for a megacore split; multiple tiles: batch
    # rows are independent, let a 2-TC chip shard them.
    semantics = ("parallel",) if grid[0] > 1 else ("arbitrary",)

    out = pl.pallas_call(
        values_kernel,
        out_shape=jax.ShapeDtypeStruct((1, b_pad), jnp.float32),
        grid=grid,
        in_specs=[
            pl.BlockSpec((N, tb), lambda i: (0, i)),   # x tile marches over batch
            pl.BlockSpec((H, N), lambda i: (0, 0)),    # weights stay VMEM-resident
            pl.BlockSpec((H, 1), lambda i: (0, 0)),
            pl.BlockSpec((H, 1), lambda i: (0, 0)),
            pl.BlockSpec(memory_space=pltpu.MemorySpace.SMEM),  # b2 scalar
        ],
        out_specs=pl.BlockSpec((1, tb), lambda i: (0, i)),      # lane-dense output
        compiler_params=pltpu.CompilerParams(dimension_semantics=semantics),
    )(xT, w1T_folded, b1_col_folded, w2_col, b2)

    return out[:, :B].reshape(B, 1)   # layout plumbing; matches nn.Module output


def init_params(key, n_states, hidden):
    """Deterministic init mirroring nn.Linear defaults (U[-1/sqrt(fan_in), +])."""
    k1, k2, k3, k4 = jax.random.split(key, 4)
    bound1 = 1.0 / math.sqrt(n_states)
    bound2 = 1.0 / math.sqrt(hidden)
    w1 = jax.random.uniform(k1, (n_states, hidden), jnp.float32, -bound1, bound1)
    b1 = jax.random.uniform(k2, (hidden,), jnp.float32, -bound1, bound1)
    w2 = jax.random.uniform(k3, (hidden,), jnp.float32, -bound2, bound2)
    b2 = jax.random.uniform(k4, (1, 1), jnp.float32, -bound2, bound2)
    return w1, b1, w2, b2


def fold_and_transpose(w1, b1, w2, diap):
    """One-time precompute.
    (x - d/2)/d @ w1 + b1 == x @ (w1 / d per-row) + (b1 - 0.5*sum_k w1[k,:]),
    emitted in the transposed layouts the kernel wants.
    NOTE: assumes diap has no zero entries (same assumption as the module)."""
    w1T_folded = (w1 / diap.reshape(-1, 1)).T                       # (H, N)
    b1_col = (b1 - 0.5 * jnp.sum(w1, axis=0)).reshape(-1, 1)        # (H, 1)
    w2_col = w2.reshape(-1, 1)                                      # (H, 1)
    return w1T_folded, b1_col, w2_col


if __name__ == "__main__":
    key = jax.random.PRNGKey(0)
    kx, kp = jax.random.split(key)

    # env.get_sizes() -> per-dimension ranges of the discrete state space.
    n_states = 4
    hidden = 128          # module default
    batch = 8             # small test batch (single grid step)
    sizes = jnp.array([10.0, 20.0, 5.0, 8.0], dtype=jnp.float32)   # (N,)

    # raw state observations in [0, size) per feature
    x = jax.random.uniform(kx, (batch, n_states), jnp.float32) * sizes

    w1, b1, w2, b2 = init_params(kp, n_states, hidden)
    w1T_f, b1_col_f, w2_col = fold_and_transpose(w1, b1, w2, sizes)  # one-time

    y = values_forward(x, w1T_f, b1_col_f, w2_col, b2)
    y = jax.block_until_ready(y)

    # pure-JAX reference (original un-folded formulation from the nn.Module)
    xn = (x - sizes / 2.0) / sizes
    ref = jnp.maximum(xn @ w1 + b1, 0.0) @ w2.reshape(-1, 1) + b2
    assert y.shape == (batch, 1)
    assert jnp.allclose(y, ref, atol=1e-4, rtol=1e-4), "mismatch vs reference"

    print("KERNEL_OK")
</pallas_src>

<mosaic_0001>
module attributes {stable_mosaic.version = 11 : i64} {
  func.func @values_kernel(%arg0: i32, %arg1: memref<4x8xf32, #tpu.memory_space<vmem>>, %arg2: memref<128x4xf32, #tpu.memory_space<vmem>>, %arg3: memref<128x1xf32, #tpu.memory_space<vmem>>, %arg4: memref<128x1xf32, #tpu.memory_space<vmem>>, %arg5: memref<1x1xf32, #tpu.memory_space<smem>>, %arg6: memref<1x8xf32, #tpu.memory_space<vmem>>) attributes {dimension_semantics = [#tpu.dimension_semantics<arbitrary>], iteration_bounds = array<i64: 1>, scalar_prefetch = 0 : i64, scratch_operands = 0 : i64, tpu.core_type = #tpu.core_type<tc>, window_params = [{transform_indices = @transform_0, window_bounds = array<i64: 4, 8>}, {pipeline_mode = #tpu.pipeline_mode<synchronous>, transform_indices = @transform_1, window_bounds = array<i64: 128, 4>}, {pipeline_mode = #tpu.pipeline_mode<synchronous>, transform_indices = @transform_2, window_bounds = array<i64: 128, 1>}, {pipeline_mode = #tpu.pipeline_mode<synchronous>, transform_indices = @transform_3, window_bounds = array<i64: 128, 1>}, {transform_indices = @transform_4, window_bounds = array<i64: 1, 1>}, {transform_indices = @transform_5, window_bounds = array<i64: 1, 8>}]} {
    %c0 = arith.constant 0 : index
    %c0_0 = arith.constant 0 : index
    %0 = vector.load %arg1[%c0, %c0_0] : memref<4x8xf32, #tpu.memory_space<vmem>>, vector<4x8xf32>
    %c0_1 = arith.constant 0 : index
    %c0_2 = arith.constant 0 : index
    %1 = vector.load %arg2[%c0_1, %c0_2] : memref<128x4xf32, #tpu.memory_space<vmem>>, vector<128x4xf32>
    %2 = vector.extract_strided_slice %1 {offsets = [0, 0], sizes = [128, 1], strides = [1, 1]} : vector<128x4xf32> to vector<128x1xf32>
    %3 = vector.extract_strided_slice %0 {offsets = [0, 0], sizes = [1, 8], strides = [1, 1]} : vector<4x8xf32> to vector<1x8xf32>
    %4 = vector.broadcast %2 : vector<128x1xf32> to vector<128x8xf32>
    %5 = vector.broadcast %3 : vector<1x8xf32> to vector<128x8xf32>
    %6 = arith.mulf %4, %5 : vector<128x8xf32>
    %7 = vector.extract_strided_slice %1 {offsets = [0, 1], sizes = [128, 1], strides = [1, 1]} : vector<128x4xf32> to vector<128x1xf32>
    %8 = vector.extract_strided_slice %0 {offsets = [1, 0], sizes = [1, 8], strides = [1, 1]} : vector<4x8xf32> to vector<1x8xf32>
    %9 = vector.broadcast %7 : vector<128x1xf32> to vector<128x8xf32>
    %10 = vector.broadcast %8 : vector<1x8xf32> to vector<128x8xf32>
    %11 = arith.mulf %9, %10 : vector<128x8xf32>
    %12 = vector.extract_strided_slice %1 {offsets = [0, 2], sizes = [128, 1], strides = [1, 1]} : vector<128x4xf32> to vector<128x1xf32>
    %13 = vector.extract_strided_slice %0 {offsets = [2, 0], sizes = [1, 8], strides = [1, 1]} : vector<4x8xf32> to vector<1x8xf32>
    %14 = vector.broadcast %12 : vector<128x1xf32> to vector<128x8xf32>
    %15 = vector.broadcast %13 : vector<1x8xf32> to vector<128x8xf32>
    %16 = arith.mulf %14, %15 : vector<128x8xf32>
    %17 = vector.extract_strided_slice %1 {offsets = [0, 3], sizes = [128, 1], strides = [1, 1]} : vector<128x4xf32> to vector<128x1xf32>
    %18 = vector.extract_strided_slice %0 {offsets = [3, 0], sizes = [1, 8], strides = [1, 1]} : vector<4x8xf32> to vector<1x8xf32>
    %19 = vector.broadcast %17 : vector<128x1xf32> to vector<128x8xf32>
    %20 = vector.broadcast %18 : vector<1x8xf32> to vector<128x8xf32>
    %21 = arith.mulf %19, %20 : vector<128x8xf32>
    %22 = arith.addf %6, %11 : vector<128x8xf32>
    %23 = arith.addf %16, %21 : vector<128x8xf32>
    %24 = arith.addf %22, %23 : vector<128x8xf32>
    %c0_3 = arith.constant 0 : index
    %c0_4 = arith.constant 0 : index
    %25 = vector.load %arg3[%c0_3, %c0_4] : memref<128x1xf32, #tpu.memory_space<vmem>>, vector<128x1xf32>
    %26 = vector.broadcast %25 : vector<128x1xf32> to vector<128x8xf32>
    %27 = arith.addf %24, %26 : vector<128x8xf32>
    %cst = arith.constant 0.000000e+00 : f32
    %28 = vector.broadcast %cst : f32 to vector<128x8xf32>
    %29 = arith.maximumf %27, %28 : vector<128x8xf32>
    %c0_5 = arith.constant 0 : index
    %c0_6 = arith.constant 0 : index
    %30 = vector.load %arg4[%c0_5, %c0_6] : memref<128x1xf32, #tpu.memory_space<vmem>>, vector<128x1xf32>
    %31 = vector.broadcast %30 : vector<128x1xf32> to vector<128x8xf32>
    %32 = arith.mulf %29, %31 : vector<128x8xf32>
    %cst_7 = arith.constant dense<0.000000e+00> : vector<8xf32>
    %33 = vector.multi_reduction <add>, %32, %cst_7 [0] : vector<128x8xf32> to vector<8xf32>
    %34 = vector.shape_cast %33 : vector<8xf32> to vector<1x8xf32>
    %c0_8 = arith.constant 0 : index
    %c0_9 = arith.constant 0 : index
    %35 = memref.load %arg5[%c0_8, %c0_9] : memref<1x1xf32, #tpu.memory_space<smem>>
    %36 = vector.broadcast %35 : f32 to vector<1x8xf32>
    %37 = arith.addf %34, %36 : vector<1x8xf32>
    %c0_10 = arith.constant 0 : index
    %c0_11 = arith.constant 0 : index
    %38 = vector.load %arg6[%c0_10, %c0_11] : memref<1x8xf32, #tpu.memory_space<vmem>>, vector<1x8xf32>
    tpu.vector_store %arg6[%c0_10, %c0_11], %37 {strides = array<i32>} : memref<1x8xf32, #tpu.memory_space<vmem>>, vector<1x8xf32>,
    return
  }
  func.func @transform_0(%arg0: i32) -> (i32, i32) {
    %c0_i32 = arith.constant 0 : i32
    %c0_i32_0 = arith.constant 0 : i32
    return %c0_i32, %arg0 : i32, i32
  }
  func.func @transform_1(%arg0: i32) -> (i32, i32) {
    %c0_i32 = arith.constant 0 : i32
    %c0_i32_0 = arith.constant 0 : i32
    %c0_i32_1 = arith.constant 0 : i32
    return %c0_i32, %c0_i32_0 : i32, i32
  }
  func.func @transform_2(%arg0: i32) -> (i32, i32) {
    %c0_i32 = arith.constant 0 : i32
    %c0_i32_0 = arith.constant 0 : i32
    %c0_i32_1 = arith.constant 0 : i32
    return %c0_i32, %c0_i32_0 : i32, i32
  }
  func.func @transform_3(%arg0: i32) -> (i32, i32) {
    %c0_i32 = arith.constant 0 : i32
    %c0_i32_0 = arith.constant 0 : i32
    %c0_i32_1 = arith.constant 0 : i32
    return %c0_i32, %c0_i32_0 : i32, i32
  }
  func.func @transform_4(%arg0: i32) -> (i32, i32) {
    %c0_i32 = arith.constant 0 : i32
    %c0_i32_0 = arith.constant 0 : i32
    %c0_i32_1 = arith.constant 0 : i32
    return %c0_i32, %c0_i32_0 : i32, i32
  }
  func.func @transform_5(%arg0: i32) -> (i32, i32) {
    %c0_i32 = arith.constant 0 : i32
    %c0_i32_0 = arith.constant 0 : i32
    return %c0_i32, %arg0 : i32, i32
  }
}

</mosaic_0001>

<bundles_post_ra>
// kernel: tpu_custom_call.1
= control target key start
LH: loop header
LB: loop body
LE: loop exit
PB: predicated region body
PF: predicated region fallthrough
CT: control target
= control target key end

     0   :  { %v772_v2 = vmov 1   ;;  %v773_v3 = vmov 0   ;;  %s1192_s0 = inlined_call_operand.vmem [shape: f32[4,8], index: 0, kind: input, shape index: {}]   ;;  %s1193_s1 = inlined_call_operand.vmem [shape: f32[128,4], index: 1, kind: input, shape index: {}]   ;;  %s1194_s2 = inlined_call_operand.vmem [shape: f32[128,1], index: 2, kind: input, shape index: {}]   ;;  %s1195_s3 = inlined_call_operand.vmem [shape: f32[128,1], index: 3, kind: input, shape index: {}]   ;;  %s1196_s4 = inlined_call_operand.<no memory space> [shape: f32[1,1], index: 4, kind: input, shape index: {}]   ;;  %s1197_s5 = inlined_call_operand.hbm [shape: f32[1,8], index: 5, kind: output, shape index: {}]  }
   0x1   :  { %v810_v0 = vld [vmem:[%s1193_s1 + $0x10] sm:$0xff]  ;;  %v815_v1 = vld [vmem:[%s1193_s1] sm:$0xff]  ;;  %742 = vset.pattern.permute.xlu0 %v772_v2  ;;  %741 = vset.pattern.permute.xlu1 %v773_v3  ;;  %v26_v4 = vld [vmem:[%s1193_s1 + $0x18] sm:$0xff] }
   0x2   :  { %51 = vperm.xlu1 %741, %v810_v0   ;;  %140 = vperm.xlu0 %742, %v815_v1  }
   0x6   :  { %56 = vperm.xlu1 %741, %v26_v4   ;;  %152 = vperm.xlu0 %742, %v26_v4  }
   0x7   :  { %11 = vsyncpa [#allocation4], 0  ;;  %v28_v5 = vld [vmem:[%s1193_s1 + $0x28] sm:$0xff]  ;;  %v30_v6 = vld [vmem:[%s1193_s1 + $0x38] sm:$0xff]  ;;  %v774_v12 = vmov 2   ;;  %v775_v19 = vmov 3   ;;  %v119_v20 = vlaneseq }
   0x8   :  { %v32_v7 = vld [vmem:[%s1193_s1 + $0x48] sm:$0xff]  ;;  %v34_v8 = vld [vmem:[%s1193_s1 + $0x58] sm:$0xff]  ;;  %v27_v13 = vld [vmem:[%s1193_s1 + $0x20] sm:$0xff]  ;;  %vm679_vm0 = vcmask 64512   ;;  %s776_s10 = smov [#allocation3]   ;;  %vm720_vm1 = vcmask 57344  }
   0x9   :  { %v36_v9 = vld [vmem:[%s1193_s1 + $0x68] sm:$0xff]  ;;  %v38_v10 = vld [vmem:[%s1193_s1 + $0x78] sm:$0xff]  ;;  %v29_v14 = vld [vmem:[%s1193_s1 + $0x30] sm:$0xff]  ;;  %v869_v21 = vshrl.u32 %v119_v20, 7  ;;  %s728_s11 = sshll.u32 %s776_s10, 4  ;;  %s729_s11 = int_to_ptr.vmem [resolvable:$true] %s728_s11 }
   0xa   :  { %66 = vperm.xlu1 %741, %v28_v5   ;;  %160 = vperm.xlu0 %742, %v28_v5   ;;  %v24_v11 = vld [vmem:[%s1193_s1 + $0x8] sm:$0xff]  ;;  %v31_v15 = vld [vmem:[%s1193_s1 + $0x40] sm:$0xff]  ;;  %v33_v16 = vld [vmem:[%s1193_s1 + $0x50] sm:$0xff]  ;;  %s750_s12 = scalar_lea.vmem %s729_s11, 16  ;;  %s754_s13 = scalar_lea.vmem %s729_s11, 32 }
   0xb   :  { %v35_v17 = vld [vmem:[%s1193_s1 + $0x60] sm:$0xff]  ;;  %v37_v18 = vld [vmem:[%s1193_s1 + $0x70] sm:$0xff]  ;;  %v205_v22 = vsub.s32 1, %v869_v21  ;;  %v121_v23 = vsub.s32 0, %v869_v21  ;;  %v440_v28 = vld [vmem:[%s1194_s2 + $0x8] sm:$0xff]  ;;  %p751_p0 = scmp.ne.s32.totalorder %s729_s11, %s750_s12  ;;  %p755_p1 = scmp.lt.s32.totalorder %s729_s11, %s729_s11 }
   0xc   :  { %v878_v25 = vld [vmem:[%s1192_s0] sm:$0xf]  ;;  %v568_v40 = vld [vmem:[%s1195_s3 + $0x8] sm:$0xff]  ;;  %v441_v48 = vld [vmem:[%s1194_s2 + $0x10] sm:$0xff]  ;;  %p756_p2 = scmp.lt.s32.totalorder %s754_s13, %s750_s12 }
   0xd   :  { %v883_v27 = vrot.slane %v878_v25, %v205_v22  ;;  %v889_v29 = vrot.slane %v878_v25, %v121_v23  ;;  %v443_v34 = vld [vmem:[%s1194_s2 + $0x20] sm:$0xff]  ;;  %v444_v47 = vld [vmem:[%s1194_s2 + $0x28] sm:$0xff]  ;;  %v445_v54 = vld [vmem:[%s1194_s2 + $0x30] sm:$0xff] }
   0xe   :  { %76 = vperm.xlu1 %741, %v30_v6   ;;  %168 = vperm.xlu0 %742, %v30_v6   ;;  %v439_v41 = vld [vmem:[%s1194_s2] sm:$0xff]  ;;  %v442_v55 = vld [vmem:[%s1194_s2 + $0x18] sm:$0xff]  ;;  %v572_v22 = vld [vmem:[%s1195_s3 + $0x28] sm:$0xff]  ;;  %p757_p3 = por %p756_p2, %p755_p1 }
   0xf   :  { %v446_v61 = vld [vmem:[%s1194_s2 + $0x38] sm:$0xff]  ;;  %v567_v62 = vld [vmem:[%s1195_s3] sm:$0xff] }
  0x10   :  { %v450_v20 = vld [vmem:[%s1194_s2 + $0x58] sm:$0xff]  ;;  %p758_p4 = pnand %p757_p3, %p751_p0 }
  0x12   :  { %86 = vperm.xlu1 %741, %v32_v7   ;;  %176 = vperm.xlu0 %742, %v32_v7  }
  0x16   :  { %96 = vperm.xlu1 %741, %v34_v8   ;;  %184 = vperm.xlu0 %742, %v34_v8  }
  0x1a   :  { %106 = vperm.xlu1 %741, %v36_v9   ;;  %192 = vperm.xlu0 %742, %v36_v9  }
  0x1e   :  { %116 = vperm.xlu1 %741, %v38_v10   ;;  %200 = vperm.xlu0 %742, %v38_v10  }
  0x22   :  { %743 = vset.pattern.permute.xlu1 %v772_v2  ;;  %745 = vset.pattern.permute.xlu0 %v774_v12 }
  0x23   :  { %144 = vperm.xlu1 %743, %v24_v11   ;;  %228 = vperm.xlu0 %745, %v24_v11  }
  0x27   :  { %148 = vperm.xlu1 %743, %v810_v0   ;;  %240 = vperm.xlu0 %745, %v27_v13  }
  0x2b   :  { %156 = vperm.xlu1 %743, %v27_v13   ;;  %248 = vperm.xlu0 %745, %v29_v14  }
  0x2f   :  { %164 = vperm.xlu1 %743, %v29_v14   ;;  %256 = vperm.xlu0 %745, %v31_v15  }
  0x33   :  { %172 = vperm.xlu1 %743, %v31_v15   ;;  %264 = vperm.xlu0 %745, %v33_v16  }
  0x37   :  { %180 = vperm.xlu1 %743, %v33_v16   ;;  %272 = vperm.xlu0 %745, %v35_v17  }
  0x3b   :  { %188 = vperm.xlu1 %743, %v35_v17   ;;  %280 = vperm.xlu0 %745, %v37_v18  }
  0x3f   :  { %196 = vperm.xlu1 %743, %v37_v18   ;;  %746 = vset.pattern.permute.xlu0 %v775_v19 }
  0x40   :  { %308 = vperm.xlu0 %746, %v815_v1  }
  0x43   :  { %744 = vset.pattern.permute.xlu1 %v774_v12  ;;  %v570_v12 = vld [vmem:[%s1195_s3 + $0x18] sm:$0xff] }
  0x44   :  { %224 = vperm.xlu1 %744, %v815_v1   ;;  %320 = vperm.xlu0 %746, %v26_v4  }
  0x48   :  { %232 = vperm.xlu1 %744, %v810_v0   ;;  %328 = vperm.xlu0 %746, %v28_v5  }
  0x4c   :  { %236 = vperm.xlu1 %744, %v26_v4   ;;  %336 = vperm.xlu0 %746, %v30_v6   ;;  %v447_v4 = vld [vmem:[%s1194_s2 + $0x40] sm:$0xff] }
  0x50   :  { %244 = vperm.xlu1 %744, %v28_v5   ;;  %344 = vperm.xlu0 %746, %v32_v7   ;;  %v569_v5 = vld [vmem:[%s1195_s3 + $0x10] sm:$0xff] }
  0x54   :  { %252 = vperm.xlu1 %744, %v30_v6   ;;  %352 = vperm.xlu0 %746, %v34_v8  }
  0x58   :  { %260 = vperm.xlu1 %744, %v32_v7   ;;  %360 = vperm.xlu0 %746, %v36_v9  }
  0x5c   :  { %268 = vperm.xlu1 %744, %v34_v8   ;;  %368 = vperm.xlu0 %746, %v38_v10  }
  0x60   :  { %276 = vperm.xlu1 %744, %v36_v9   ;;  %748 = vset.pattern.permute.xlu0 %v773_v3 }
  0x61   :  { %41 = vperm.xlu0 %748, %v815_v1  }
  0x64   :  { %284 = vperm.xlu1 %744, %v38_v10  }
  0x65   :  { %46 = vperm.xlu0 %748, %v24_v11  }
  0x68   :  { %747 = vset.pattern.permute.xlu1 %v775_v19 }
  0x69   :  { %312 = vperm.xlu1 %747, %v24_v11   ;;  %61 = vperm.xlu0 %748, %v27_v13   ;;  %v448_v11 = vld [vmem:[%s1194_s2 + $0x48] sm:$0xff] }
  0x6d   :  { %316 = vperm.xlu1 %747, %v810_v0   ;;  %71 = vperm.xlu0 %748, %v29_v14  }
  0x71   :  { %324 = vperm.xlu1 %747, %v27_v13   ;;  %81 = vperm.xlu0 %748, %v31_v15  }
  0x75   :  { %332 = vperm.xlu1 %747, %v29_v14   ;;  %91 = vperm.xlu0 %748, %v33_v16  }
  0x79   :  { %340 = vperm.xlu1 %747, %v31_v15   ;;  %101 = vperm.xlu0 %748, %v35_v17  }
  0x7d   :  { %v873_v24 = vpop.permute.xlu1 %51  ;;  %348 = vperm.xlu1 %747, %v33_v16   ;;  %111 = vperm.xlu0 %748, %v37_v18   ;;  %v880_v26 = vpop.permute.xlu0 %140  ;;  %v449_v16 = vld [vmem:[%s1194_s2 + $0x50] sm:$0xff] }
  0x81   :  { %v57_v30 = vpop.permute.xlu1 %56  ;;  %356 = vperm.xlu1 %747, %v35_v17   ;;  %462 = vperm.xlu0 %748, %v440_v28   ;;  %v153_v31 = vpop.permute.xlu0 %152  ;;  %v571_v17 = vld [vmem:[%s1195_s3 + $0x20] sm:$0xff] }
  0x82   :  { %v126_v32 = vmul.f32 %v889_v29, %v57_v30  ;;  %v210_v33 = vmul.f32 %v883_v27, %v153_v31  ;;  %v451_v30 = vld [vmem:[%s1194_s2 + $0x60] sm:$0xff]  ;;  %v573_v31 = vld [vmem:[%s1195_s3 + $0x30] sm:$0xff] }
  0x84   :  { %v896_v35 = vadd.f32 %v210_v33, %v126_v32 }
  0x85   :  { %v67_v36 = vpop.permute.xlu1 %66  ;;  %364 = vperm.xlu1 %747, %v37_v18   ;;  %477 = vperm.xlu0 %748, %v443_v34   ;;  %v161_v37 = vpop.permute.xlu0 %160  ;;  %v452_v34 = vld [vmem:[%s1194_s2 + $0x68] sm:$0xff] }
  0x86   :  { %v128_v38 = vmul.f32 %v889_v29, %v67_v36  ;;  %v212_v39 = vmul.f32 %v883_v27, %v161_v37  ;;  %v574_v36 = vld [vmem:[%s1195_s3 + $0x38] sm:$0xff] }
  0x88   :  { %v906_v42 = vadd.f32 %v212_v39, %v128_v38  ;;  %v453_v39 = vld [vmem:[%s1194_s2 + $0x70] sm:$0xff] }
  0x89   :  { %v77_v43 = vpop.permute.xlu1 %76  ;;  %749 = vset.pattern.permute.xlu1 %v773_v3  ;;  %590 = vperm.xlu0 %748, %v568_v40   ;;  %v169_v44 = vpop.permute.xlu0 %168  ;;  %v575_v40 = vld [vmem:[%s1195_s3 + $0x40] sm:$0xff] }
  0x8a   :  { %v130_v45 = vmul.f32 %v889_v29, %v77_v43  ;;  %v214_v46 = vmul.f32 %v883_v27, %v169_v44  ;;  %457 = vperm.xlu1 %749, %v439_v41   ;;  %v454_v44 = vld [vmem:[%s1194_s2 + $0x78] sm:$0xff] }
  0x8c   :  { %v917_v49 = vadd.f32 %v214_v46, %v130_v45  ;;  %v576_v45 = vld [vmem:[%s1195_s3 + $0x48] sm:$0xff] }
  0x8d   :  { %v87_v50 = vpop.permute.xlu1 %86  ;;  %482 = vperm.xlu0 %748, %v444_v47   ;;  %v177_v51 = vpop.permute.xlu0 %176 }
  0x8e   :  { %v132_v52 = vmul.f32 %v889_v29, %v87_v50  ;;  %v216_v53 = vmul.f32 %v883_v27, %v177_v51  ;;  %467 = vperm.xlu1 %749, %v441_v48   ;;  %v581_v48 = vld [vmem:[%s1195_s3 + $0x70] sm:$0xff]  ;;  %v373_v50 = vsub.s32 3, %v869_v21 }
  0x8f   :  { %v577_v51 = vld [vmem:[%s1195_s3 + $0x50] sm:$0xff] }
  0x90   :  { %v927_v56 = vadd.f32 %v216_v53, %v132_v52  ;;  %v289_v52 = vsub.s32 2, %v869_v21  ;;  %v579_v21 = vld [vmem:[%s1195_s3 + $0x60] sm:$0xff] }
  0x91   :  { %v97_v57 = vpop.permute.xlu1 %96  ;;  %487 = vperm.xlu0 %748, %v445_v54   ;;  %v185_v58 = vpop.permute.xlu0 %184  ;;  %v1034_v54 = vrot.slane %v878_v25, %v373_v50 }
  0x92   :  { %v134_v59 = vmul.f32 %v889_v29, %v97_v57  ;;  %v218_v60 = vmul.f32 %v883_v27, %v185_v58  ;;  %472 = vperm.xlu1 %749, %v442_v55   ;;  %v578_v57 = vld [vmem:[%s1195_s3 + $0x58] sm:$0xff]  ;;  %v1040_v58 = vrot.slane %v878_v25, %v289_v52  ;;  %v580_v25 = vld [vmem:[%s1195_s3 + $0x68] sm:$0xff] }
  0x94   :  { %v937_v63 = vadd.f32 %v218_v60, %v134_v59 }
  0x95   :  { %v107_v0 = vpop.permute.xlu1 %106  ;;  %492 = vperm.xlu0 %748, %v446_v61   ;;  %v193_v1 = vpop.permute.xlu0 %192 }
  0x96   :  { %v136_v2 = vmul.f32 %v889_v29, %v107_v0  ;;  %v220_v3 = vmul.f32 %v883_v27, %v193_v1  ;;  %585 = vperm.xlu1 %749, %v567_v62  }
  0x98   :  { %v947_v6 = vadd.f32 %v220_v3, %v136_v2 }
  0x99   :  { %v117_v7 = vpop.permute.xlu1 %116  ;;  %497 = vperm.xlu0 %748, %v447_v4   ;;  %v201_v8 = vpop.permute.xlu0 %200 }
  0x9a   :  { %v138_v9 = vmul.f32 %v889_v29, %v117_v7  ;;  %v222_v10 = vmul.f32 %v883_v27, %v201_v8  ;;  %595 = vperm.xlu1 %749, %v569_v5   ;;  %v582_v7 = vld [vmem:[%s1195_s3 + $0x78] sm:$0xff] }
  0x9c   :  { %v957_v13 = vadd.f32 %v222_v10, %v138_v9 }
  0x9d   :  { %502 = vperm.xlu0 %748, %v448_v11  }
  0x9e   :  { %v959_v14 = vpop.permute.xlu1 %144  ;;  %600 = vperm.xlu1 %749, %v570_v12   ;;  %v961_v15 = vpop.permute.xlu0 %228 }
  0xa1   :  { %507 = vperm.xlu0 %748, %v449_v16  }
  0xa2   :  { %v969_v18 = vpop.permute.xlu1 %148  ;;  %605 = vperm.xlu1 %749, %v571_v17   ;;  %v971_v19 = vpop.permute.xlu0 %240 }
  0xa5   :  { %512 = vperm.xlu0 %748, %v450_v20  }
  0xa6   :  { %v979_v23 = vpop.permute.xlu1 %156  ;;  %610 = vperm.xlu1 %749, %v572_v22   ;;  %v981_v28 = vpop.permute.xlu0 %248 }
  0xa9   :  { %517 = vperm.xlu0 %748, %v451_v30  }
  0xaa   :  { %v989_v32 = vpop.permute.xlu1 %164  ;;  %615 = vperm.xlu1 %749, %v573_v31   ;;  %v991_v33 = vpop.permute.xlu0 %256 }
  0xad   :  { %522 = vperm.xlu0 %748, %v452_v34  }
  0xae   :  { %v999_v37 = vpop.permute.xlu1 %172  ;;  %620 = vperm.xlu1 %749, %v574_v36   ;;  %v1001_v38 = vpop.permute.xlu0 %264 }
  0xb1   :  { %527 = vperm.xlu0 %748, %v453_v39  }
  0xb2   :  { %v1009_v41 = vpop.permute.xlu1 %180  ;;  %625 = vperm.xlu1 %749, %v575_v40   ;;  %v1011_v43 = vpop.permute.xlu0 %272 }
  0xb5   :  { %532 = vperm.xlu0 %748, %v454_v44  }
  0xb6   :  { %v1019_v46 = vpop.permute.xlu1 %188  ;;  %630 = vperm.xlu1 %749, %v576_v45   ;;  %v1021_v47 = vpop.permute.xlu0 %280 }
  0xb9   :  { %655 = vperm.xlu0 %748, %v581_v48  }
  0xba   :  { %v1031_v53 = vpop.permute.xlu1 %196  ;;  %635 = vperm.xlu1 %749, %v577_v51  }
  0xbb   :  { %v309_v55 = vpop.permute.xlu0 %308 }
  0xbc   :  { %v375_v59 = vmul.f32 %v1034_v54, %v309_v55 }
  0xbe   :  { %640 = vperm.xlu1 %749, %v578_v57  }
  0xbf   :  { %v225_v60 = vpop.permute.xlu1 %224  ;;  %v321_v61 = vpop.permute.xlu0 %320 }
  0xc0   :  { %v291_v62 = vmul.f32 %v1040_v58, %v225_v60  ;;  %v378_v3 = vmul.f32 %v1034_v54, %v321_v61 }
  0xc2   :  { %v407_v0 = vadd.f32 %v375_v59, %v291_v62  ;;  %645 = vperm.xlu1 %749, %v579_v21  }
  0xc3   :  { %v1047_v1 = vpop.permute.xlu1 %232  ;;  %v329_v2 = vpop.permute.xlu0 %328 }
  0xc4   :  { %v380_v9 = vmul.f32 %v1034_v54, %v329_v2  ;;  %v207_v2 = vmul.f32 %v883_v27, %v880_v26 }
  0xc6   :  { %650 = vperm.xlu1 %749, %v580_v25  }
  0xc7   :  { %v237_v4 = vpop.permute.xlu1 %236  ;;  %v337_v5 = vpop.permute.xlu0 %336 }
  0xc8   :  { %v294_v8 = vmul.f32 %v1040_v58, %v237_v4  ;;  %v382_v31 = vmul.f32 %v1034_v54, %v337_v5 }
  0xca   :  { %v410_v10 = vadd.f32 %v378_v3, %v294_v8  ;;  %660 = vperm.xlu1 %749, %v582_v7  }
  0xcb   :  { %v245_v11 = vpop.permute.xlu1 %244  ;;  %v345_v12 = vpop.permute.xlu0 %344 }
  0xcc   :  { %v296_v16 = vmul.f32 %v1040_v58, %v245_v11  ;;  %v1060_v17 = vadd.f32 %v410_v10, %v896_v35  ;;  %v384_v45 = vmul.f32 %v1034_v54, %v345_v12 }
  0xce   :  { %v412_v20 = vadd.f32 %v380_v9, %v296_v16 }
  0xcf   :  { %v253_v22 = vpop.permute.xlu1 %252  ;;  %v353_v30 = vpop.permute.xlu0 %352 }
  0xd0   :  { %v298_v34 = vmul.f32 %v1040_v58, %v253_v22  ;;  %v1065_v36 = vadd.f32 %v412_v20, %v906_v42  ;;  %v386_v55 = vmul.f32 %v1034_v54, %v353_v30  ;;  %v208_v20 = vmul.f32 %v883_v27, %v959_v14 }
  0xd1   :  { %v292_v22 = vmul.f32 %v1040_v58, %v961_v15 }
  0xd2   :  { %v414_v39 = vadd.f32 %v382_v31, %v298_v34 }
  0xd3   :  { %v261_v40 = vpop.permute.xlu1 %260  ;;  %v361_v44 = vpop.permute.xlu0 %360 }
  0xd4   :  { %v300_v48 = vmul.f32 %v1040_v58, %v261_v40  ;;  %v1070_v35 = vadd.f32 %v414_v39, %v917_v49  ;;  %v388_v61 = vmul.f32 %v1034_v54, %v361_v44  ;;  %v125_v40 = vmul.f32 %v889_v29, %v873_v24 }
  0xd6   :  { %v416_v50 = vadd.f32 %v384_v45, %v300_v48 }
  0xd7   :  { %v269_v51 = vpop.permute.xlu1 %268  ;;  %v369_v52 = vpop.permute.xlu0 %368 }
  0xd8   :  { %v302_v57 = vmul.f32 %v1040_v58, %v269_v51  ;;  %v1075_v42 = vadd.f32 %v416_v50, %v927_v56  ;;  %v390_v56 = vmul.f32 %v1034_v54, %v369_v52  ;;  %v211_v52 = vmul.f32 %v883_v27, %v979_v23 }
  0xda   :  { %v418_v59 = vadd.f32 %v386_v55, %v302_v57 }
  0xdb   :  { %v277_v60 = vpop.permute.xlu1 %276 }
  0xdc   :  { %v304_v21 = vmul.f32 %v1040_v58, %v277_v60  ;;  %v42_v62 = vpop.permute.xlu0 %41  ;;  %v1080_v49 = vadd.f32 %v418_v59, %v937_v63 }
  0xdd   :  { %v123_v25 = vmul.f32 %v889_v29, %v42_v62  ;;  %v213_v62 = vmul.f32 %v883_v27, %v989_v32 }
  0xde   :  { %v420_v3 = vadd.f32 %v388_v61, %v304_v21  ;;  %v297_v21 = vmul.f32 %v1040_v58, %v981_v28 }
  0xdf   :  { %v391_v4 = vadd.f32 %v207_v2, %v123_v25  ;;  %v285_v5 = vpop.permute.xlu1 %284 }
  0xe0   :  { %v306_v7 = vmul.f32 %v1040_v58, %v285_v5  ;;  %v47_v8 = vpop.permute.xlu0 %46  ;;  %v1088_v9 = vadd.f32 %v420_v3, %v947_v6  ;;  %v209_v6 = vmul.f32 %v883_v27, %v969_v18  ;;  %v295_v18 = vmul.f32 %v1040_v58, %v971_v19 }
  0xe1   :  { %v1090_v10 = vadd.f32 %v407_v0, %v391_v4  ;;  %v124_v11 = vmul.f32 %v889_v29, %v47_v8 }
  0xe2   :  { %v422_v63 = vadd.f32 %v390_v56, %v306_v7  ;;  %v393_v45 = vadd.f32 %v209_v6, %v125_v40  ;;  %v299_v56 = vmul.f32 %v1040_v58, %v991_v33  ;;  %v215_v7 = vmul.f32 %v883_v27, %v999_v37 }
  0xe3   :  { %v392_v0 = vadd.f32 %v208_v20, %v124_v11  ;;  %v301_v20 = vmul.f32 %v1040_v58, %v1001_v38  ;;  %v219_v40 = vmul.f32 %v883_v27, %v1019_v46 }
  0xe4   :  { %v313_v12 = vpop.permute.xlu1 %312  ;;  %v62_v26 = vpop.permute.xlu0 %61  ;;  %v1094_v16 = vadd.f32 %v422_v63, %v957_v13  ;;  %v293_v13 = vmul.f32 %v1040_v58, %v1047_v1 }
  0xe5   :  { %v376_v30 = vmul.f32 %v1034_v54, %v313_v12  ;;  %v127_v15 = vmul.f32 %v889_v29, %v62_v26 }
  0xe7   :  { %v408_v31 = vadd.f32 %v376_v30, %v292_v22  ;;  %v395_v57 = vadd.f32 %v211_v52, %v127_v15  ;;  %v217_v22 = vmul.f32 %v883_v27, %v1009_v41 }
  0xe8   :  { %v317_v34 = vpop.permute.xlu1 %316  ;;  %v72_v39 = vpop.permute.xlu0 %71 }
  0xe9   :  { %v377_v14 = vmul.f32 %v1034_v54, %v317_v34  ;;  %v424_v44 = vadd.f32 %v408_v31, %v392_v0  ;;  %v129_v1 = vmul.f32 %v889_v29, %v72_v39  ;;  %v303_v39 = vmul.f32 %v1040_v58, %v1011_v43 }
  0xeb   :  { %v409_v48 = vadd.f32 %v377_v14, %v293_v13  ;;  %v397_v23 = vadd.f32 %v213_v62, %v129_v1 }
  0xec   :  { %v325_v50 = vpop.permute.xlu1 %324  ;;  %v82_v51 = vpop.permute.xlu0 %81 }
  0xed   :  { %v379_v24 = vmul.f32 %v1034_v54, %v325_v50  ;;  %v425_v55 = vadd.f32 %v409_v48, %v393_v45  ;;  %v131_v25 = vmul.f32 %v889_v29, %v82_v51  ;;  %v305_v50 = vmul.f32 %v1040_v58, %v1021_v47 }
  0xee   :  { %v221_v51 = vmul.f32 %v883_v27, %v1031_v53 }
  0xef   :  { %v411_v59 = vadd.f32 %v379_v24, %v295_v18  ;;  %v399_v32 = vadd.f32 %v215_v7, %v131_v25 }
  0xf0   :  { %v333_v60 = vpop.permute.xlu1 %332  ;;  %v92_v61 = vpop.permute.xlu0 %91 }
  0xf1   :  { %v381_v19 = vmul.f32 %v1034_v54, %v333_v60  ;;  %v1120_v2 = vadd.f32 %v411_v59, %v395_v57  ;;  %v133_v63 = vmul.f32 %v889_v29, %v92_v61 }
  0xf3   :  { %v413_v3 = vadd.f32 %v381_v19, %v297_v21  ;;  %v401_v37 = vadd.f32 %v217_v22, %v133_v63 }
  0xf4   :  { %v341_v4 = vpop.permute.xlu1 %340  ;;  %v102_v5 = vpop.permute.xlu0 %101 }
  0xf5   :  { %v383_v28 = vmul.f32 %v1034_v54, %v341_v4  ;;  %v1128_v8 = vadd.f32 %v413_v3, %v397_v23  ;;  %v135_v6 = vmul.f32 %v889_v29, %v102_v5 }
  0xf7   :  { %v415_v11 = vadd.f32 %v383_v28, %v299_v56  ;;  %v403_v41 = vadd.f32 %v219_v40, %v135_v6 }
  0xf8   :  { %v349_v12 = vpop.permute.xlu1 %348  ;;  %v112_v26 = vpop.permute.xlu0 %111 }
  0xf9   :  { %v385_v33 = vmul.f32 %v1034_v54, %v349_v12  ;;  %v1136_v30 = vadd.f32 %v415_v11, %v399_v32  ;;  %v137_v14 = vmul.f32 %v889_v29, %v112_v26 }
  0xfb   :  { %v417_v0 = vadd.f32 %v385_v33, %v301_v20  ;;  %v405_v46 = vadd.f32 %v221_v51, %v137_v14 }
  0xfc   :  { %v357_v31 = vpop.permute.xlu1 %356  ;;  %v463_v34 = vpop.permute.xlu0 %462 }
  0xfd   :  { %v387_v38 = vmul.f32 %v1034_v54, %v357_v31  ;;  %v1144_v13 = vadd.f32 %v417_v0, %v401_v37  ;;  %v536_v60 = vadd.f32 %v463_v34, %v424_v44 }
  0xff   :  { %v419_v45 = vadd.f32 %v387_v38, %v303_v39  ;;  %v552_v58 = vmax.f32 %v536_v60, 0.0 }
 0x100   :  { %v365_v15 = vpop.permute.xlu1 %364  ;;  %v478_v48 = vpop.permute.xlu0 %477 }
 0x101   :  { %v389_v43 = vmul.f32 %v1034_v54, %v365_v15  ;;  %v1152_v18 = vadd.f32 %v419_v45, %v403_v41  ;;  %v539_v28 = vadd.f32 %v478_v48, %v1120_v2 }
 0x103   :  { %v421_v52 = vadd.f32 %v389_v43, %v305_v50  ;;  %v555_v20 = vmax.f32 %v539_v28, 0.0 }
 0x104   :  { %v591_v24 = vpop.permute.xlu0 %590 }
 0x105   :  { %v458_v57 = vpop.permute.xlu1 %457  ;;  %v1154_v1 = vadd.f32 %v421_v52, %v405_v46  ;;  %v664_v62 = vmul.f32 %v591_v24, %v552_v58 }
 0x106   :  { %v535_v61 = vadd.f32 %v458_v57, %v1090_v10 }
 0x107   :  { %v681_v25 = vsel %vm679_vm0, %v664_v62, 0.0 }
 0x108   :  { %v483_v29 = vpop.permute.xlu0 %482  ;;  %v551_v27 = vmax.f32 %v535_v61, 0.0 }
 0x109   :  { %v468_v59 = vpop.permute.xlu1 %467  ;;  %v540_v22 = vadd.f32 %v483_v29, %v1065_v36 }
 0x10a   :  { %v537_v53 = vadd.f32 %v468_v59, %v425_v55 }
 0x10b   :  { %v556_v31 = vmax.f32 %v540_v22, 0.0 }
 0x10c   :  { %v488_v21 = vpop.permute.xlu0 %487  ;;  %v553_v3 = vmax.f32 %v537_v53, 0.0 }
 0x10d   :  { %v473_v47 = vpop.permute.xlu1 %472  ;;  %v541_v34 = vadd.f32 %v488_v21, %v1128_v8 }
 0x10e   :  { %v538_v4 = vadd.f32 %v473_v47, %v1060_v17 }
 0x10f   :  { %v557_v14 = vmax.f32 %v541_v34, 0.0 }
 0x110   :  { %v493_v54 = vpop.permute.xlu0 %492  ;;  %v554_v32 = vmax.f32 %v538_v4, 0.0 }
 0x111   :  { %v586_v19 = vpop.permute.xlu1 %585  ;;  %v542_v45 = vadd.f32 %v493_v54, %v1070_v35 }
 0x112   :  { %v663_v23 = vmul.f32 %v586_v19, %v551_v27 }
 0x113   :  { %v558_v43 = vmax.f32 %v542_v45, 0.0 }
 0x114   :  { %v680_v5 = vsel %vm679_vm0, %v663_v23, 0.0  ;;  %v498_v44 = vpop.permute.xlu0 %497 }
 0x115   :  { %v682_v56 = vadd.f32 %v681_v25, %v680_v5  ;;  %v596_v10 = vpop.permute.xlu1 %595  ;;  %v543_v46 = vadd.f32 %v498_v44, %v1136_v30 }
 0x116   :  { %v665_v7 = vmul.f32 %v596_v10, %v553_v3 }
 0x117   :  { %v559_v29 = vmax.f32 %v543_v46, 0.0 }
 0x118   :  { %v683_v55 = vsel %vm679_vm0, %v665_v7, 0.0  ;;  %v503_v63 = vpop.permute.xlu0 %502 }
 0x119   :  { %v684_v11 = vadd.f32 %v683_v55, %v682_v56  ;;  %v601_v12 = vpop.permute.xlu1 %600  ;;  %v544_v59 = vadd.f32 %v503_v63, %v1075_v42 }
 0x11a   :  { %v666_v26 = vmul.f32 %v601_v12, %v554_v32 }
 0x11b   :  { %v560_v58 = vmax.f32 %v544_v59, 0.0 }
 0x11c   :  { %v685_v17 = vsel %vm679_vm0, %v666_v26, 0.0  ;;  %v508_v33 = vpop.permute.xlu0 %507 }
 0x11d   :  { %v686_v37 = vadd.f32 %v685_v17, %v684_v11  ;;  %v606_v6 = vpop.permute.xlu1 %605  ;;  %v545_v62 = vadd.f32 %v508_v33, %v1144_v13 }
 0x11e   :  { %v667_v0 = vmul.f32 %v606_v6, %v555_v20 }
 0x11f   :  { %v561_v23 = vmax.f32 %v545_v62, 0.0 }
 0x120   :  { %v687_v2 = vsel %vm679_vm0, %v667_v0, 0.0  ;;  %v513_v40 = vpop.permute.xlu0 %512 }
 0x121   :  { %v688_v39 = vadd.f32 %v687_v2, %v686_v37  ;;  %v611_v38 = vpop.permute.xlu1 %610  ;;  %v546_v25 = vadd.f32 %v513_v40, %v1080_v49 }
 0x122   :  { %v668_v41 = vmul.f32 %v611_v38, %v556_v31 }
 0x123   :  { %v562_v44 = vmax.f32 %v546_v25, 0.0 }
 0x124   :  { %v689_v36 = vsel %vm679_vm0, %v668_v41, 0.0  ;;  %v518_v51 = vpop.permute.xlu0 %517 }
 0x125   :  { %v690_v15 = vadd.f32 %v689_v36, %v688_v39  ;;  %v616_v48 = vpop.permute.xlu1 %615  ;;  %v547_v56 = vadd.f32 %v518_v51, %v1152_v18  ;;  %v718_v51 = vstv %s1196_s4 }
 0x126   :  { %v669_v50 = vmul.f32 %v616_v48, %v557_v14 }
 0x127   :  { %v563_v55 = vmax.f32 %v547_v56, 0.0 }
 0x128   :  { %v691_v8 = vsel %vm679_vm0, %v669_v50, 0.0  ;;  %v523_v35 = vpop.permute.xlu0 %522 }
 0x129   :  { %v692_v52 = vadd.f32 %v691_v8, %v690_v15  ;;  %v621_v24 = vpop.permute.xlu1 %620  ;;  %v548_v63 = vadd.f32 %v523_v35, %v1088_v9 }
 0x12a   :  { %v670_v57 = vmul.f32 %v621_v24, %v558_v43 }
 0x12b   :  { %v564_v17 = vmax.f32 %v548_v63, 0.0 }
 0x12c   :  { %v693_v60 = vsel %vm679_vm0, %v670_v57, 0.0  ;;  %v528_v19 = vpop.permute.xlu0 %527 }
 0x12d   :  { %v694_v61 = vadd.f32 %v693_v60, %v692_v52  ;;  %v626_v21 = vpop.permute.xlu1 %625  ;;  %v549_v11 = vadd.f32 %v528_v19, %v1154_v1 }
 0x12e   :  { %v671_v47 = vmul.f32 %v626_v21, %v559_v29 }
 0x12f   :  { %v565_v33 = vmax.f32 %v549_v11, 0.0 }
 0x130   :  { %v695_v27 = vsel %vm679_vm0, %v671_v47, 0.0  ;;  %v533_v13 = vpop.permute.xlu0 %532 }
 0x131   :  { %v696_v30 = vadd.f32 %v695_v27, %v694_v61  ;;  %v631_v53 = vpop.permute.xlu1 %630  ;;  %v550_v18 = vadd.f32 %v533_v13, %v1094_v16 }
 0x132   :  { %v672_v54 = vmul.f32 %v631_v53, %v560_v58 }
 0x133   :  { %v566_v2 = vmax.f32 %v550_v18, 0.0 }
 0x134   :  { %v697_v42 = vsel %vm679_vm0, %v672_v54, 0.0  ;;  %v656_v22 = vpop.permute.xlu0 %655 }
 0x135   :  { %v698_v3 = vadd.f32 %v697_v42, %v696_v30  ;;  %v636_v4 = vpop.permute.xlu1 %635  ;;  %v677_v31 = vmul.f32 %v656_v22, %v565_v33 }
 0x136   :  { %v673_v5 = vmul.f32 %v636_v4, %v561_v23 }
 0x137   :  { %v707_v40 = vsel %vm679_vm0, %v677_v31, 0.0 }
 0x138   :  { %v699_v10 = vsel %vm679_vm0, %v673_v5, 0.0 }
 0x139   :  { %v700_v7 = vadd.f32 %v699_v10, %v698_v3  ;;  %v641_v28 = vpop.permute.xlu1 %640 }
 0x13a   :  { %v674_v32 = vmul.f32 %v641_v28, %v562_v44 }
 0x13c   :  { %v701_v49 = vsel %vm679_vm0, %v674_v32, 0.0 }
 0x13d   :  { %v702_v12 = vadd.f32 %v701_v49, %v700_v7  ;;  %v646_v26 = vpop.permute.xlu1 %645 }
 0x13e   :  { %v675_v20 = vmul.f32 %v646_v26, %v563_v55 }
 0x140   :  { %v703_v37 = vsel %vm679_vm0, %v675_v20, 0.0 }
 0x141   :  { %v704_v6 = vadd.f32 %v703_v37, %v702_v12  ;;  %v651_v0 = vpop.permute.xlu1 %650 }
 0x142   :  { %v676_v34 = vmul.f32 %v651_v0, %v564_v17 }
 0x144   :  { %v705_v9 = vsel %vm679_vm0, %v676_v34, 0.0 }
 0x145   :  { %v706_v1 = vadd.f32 %v705_v9, %v704_v6  ;;  %v661_v39 = vpop.permute.xlu1 %660 }
 0x146   :  { %v678_v38 = vmul.f32 %v661_v39, %v566_v2 }
 0x147   :  { %v708_v41 = vadd.f32 %v707_v40, %v706_v1 }
 0x148   :  { %v709_v14 = vsel %vm679_vm0, %v678_v38, 0.0 }
 0x149   :  { %v710_v45 = vadd.f32 %v709_v14, %v708_v41 }
 0x14b   :  { %v711_v36 = vrot.slane %v710_v45, 4 }
 0x14d   :  { %v712_v16 = vadd.f32 %v711_v36, %v710_v45 }
 0x14f   :  { %v713_v15 = vrot.slane %v712_v16, 2 }
 0x151   :  { %v714_v48 = vadd.f32 %v713_v15, %v712_v16 }
 0x153   :  { %v715_v50 = vrot.slane %v714_v48, 1 }
 0x155   :  { %v716_v43 = vadd.f32 %v715_v50, %v714_v48 }
 0x157   :  { %v719_v46 = vadd.f32 %v718_v51, %v716_v43 }
 0x159   :  { %721 = vst.msk [vmem:[#allocation3] sm:$0x1] %vm720_vm1, %v719_v46 }
 0x15a   :  { %761 = shalt.err (!%p758_p4)
}
 0x15b   :  { %731 = dma.vmem_to_hbm [thread:$0]  %s729_s11, 16, %s1197_s5, [#allocation4]  }
 0x15c   :  { %770 = dma.done.wait [#allocation4], 16  }
 0x15d   :  { %771 = vsyncadd [#allocation4], 4294967280 }
 0x15e   :  { %735 = vsyncpa [#allocation4], 1 }

</bundles_post_ra>
